<compile_context>
chip_gen: v7x
topology: tpu7x:2x2x1
jax: 0.10.0
libtpu: 0.0.40
codegen_flags: <defaults>
</compile_context>

<pallas_src>
import functools

import jax
import jax.numpy as jnp
import numpy as np
from jax import lax
from jax.experimental import pallas as pl
from jax.experimental.pallas import tpu as pltpu


def _soft_pose_kernel(yh_ref, y_ref, out_ref, *,
                      tile_rows, fold_rows, tiles_per_split, total_rows,
                      needs_mask, compute_flow, nonlinear_flow, flow_c,
                      use_soft_mask):
    """Accumulates into out_ref (3, fold_rows, 128):
       row 0 = center SSE, row 1 = boundary SSE, row 2 = flow L1 (both chans).
    """
    s = pl.program_id(1)   # spatial split (megacore) index
    t = pl.program_id(2)   # row-tile index within the split

    @pl.when(t == 0)
    def _():
        out_ref[...] = jnp.zeros_like(out_ref)

    def load(ref, c):
        return ref[c].astype(jnp.float32)          # (tile_rows, 128)

    yh0, yt0 = load(yh_ref, 0), load(y_ref, 0)      # center
    yh1, yt1 = load(yh_ref, 1), load(y_ref, 1)      # boundary

    if needs_mask:
        remaining = total_rows - (s * tiles_per_split + t) * tile_rows
        row_ids = lax.broadcasted_iota(jnp.int32, (tile_rows, 128), 0)
        valid = row_ids < remaining
        mask_fn = lambda x: jnp.where(valid, x, 0.0)
    else:
        mask_fn = lambda x: x

    def fold(x):  # (tile_rows,128) -> (fold_rows,128), whole-vreg VALU adds
        if tile_rows == fold_rows:
            return x
        return jnp.sum(x.reshape(tile_rows // fold_rows, fold_rows, 128),
                       axis=0)

    dc = yh0 - yt0
    db = yh1 - yt1
    out_ref[0] += fold(mask_fn(dc * dc))
    out_ref[1] += fold(mask_fn(db * db))

    if compute_flow:
        yh2, yt2 = load(yh_ref, 2), load(y_ref, 2)  # vflow
        yh3, yt3 = load(yh_ref, 3), load(y_ref, 3)  # hflow
        if nonlinear_flow:
            fv = jnp.tanh(flow_c * yh2) - yt2       # EUP tanh
            fh = jnp.tanh(flow_c * yh3) - yt3
        else:
            fv = yh2 - yt2
            fh = yh3 - yt3
        l1 = jnp.abs(fv) + jnp.abs(fh)
        if use_soft_mask:
            l1 = l1 * jnp.clip(1.0 - yt0 - yt1, 0.0, 1.0)
        out_ref[2] += fold(mask_fn(l1))


def _choose_tile_rows(num_rows, itemsize, max_rows=512):
    """Rows per tile: dtype-native sublane quantum, capped at max_rows."""
    q = {4: 8, 2: 16, 1: 32}.get(int(itemsize), 8)
    if num_rows < q:
        return num_rows                      # full-extent block (always legal)
    return max(q, (min(num_rows, max_rows) // q) * q)


def soft_pose_loss(y_hat, y, *, soft_a=1.0, soft_b=1.0, soft_c=1.0,
                   nonlinear_flow=True, flow_c=1.0, soft_mask=True,
                   max_tile_rows=512):
    """Pallas implementation of SoftPoseLoss.forward.

    Returns [center_loss, boundary_loss, mean_flow_loss, sum_loss] (f32).
    """
    B, C, H, W = y_hat.shape
    assert C == 4, "expected 4 channels: [point, boundary, vflow, hflow]"
    S = H * W
    compute_flow = (soft_c != 0)
    n_ch = 4 if compute_flow else 2          # skip flow channels' HBM reads

    # Lane-dense view [B, 4, R, 128]; free reshape when S % 128 == 0.
    yh = y_hat.reshape(B, 4, S)
    yt = y.reshape(B, 4, S)
    if S % 128 != 0:
        # TODO(synk): a fully copy-free path for misaligned S needs manual DMA
        # from pl.ANY (or a separate tail pass); zero pad contributes 0.
        pad = 128 - S % 128
        yh = jnp.pad(yh, ((0, 0), (0, 0), (0, pad)))
        yt = jnp.pad(yt, ((0, 0), (0, 0), (0, pad)))
    R = yh.shape[-1] // 128
    yh = yh.reshape(B, 4, R, 128)
    yt = yt.reshape(B, 4, R, 128)

    itemsize = jnp.dtype(y_hat.dtype).itemsize
    tile_rows = _choose_tile_rows(R, itemsize, max_tile_rows)
    fold_rows = 8 if tile_rows % 8 == 0 else tile_rows
    total_blocks = pl.cdiv(R, tile_rows)

    # v7x megacore: split the spatial range across a 2nd parallel axis for B=1.
    splits = 2 if (B == 1 and total_blocks >= 2 and total_blocks % 2 == 0) else 1
    tiles_per_split = total_blocks // splits
    needs_mask = (total_blocks * tile_rows != R)

    kernel = functools.partial(
        _soft_pose_kernel,
        tile_rows=tile_rows, fold_rows=fold_rows,
        tiles_per_split=tiles_per_split, total_rows=R,
        needs_mask=bool(needs_mask),
        compute_flow=bool(compute_flow),
        nonlinear_flow=bool(nonlinear_flow),
        flow_c=float(flow_c),
        use_soft_mask=bool(soft_mask),
    )

    in_map = lambda b, s, t: (b, 0, s * tiles_per_split + t, 0)
    out_map = lambda b, s, t: (b, s, 0, 0, 0)

    partials = pl.pallas_call(
        kernel,
        out_shape=jax.ShapeDtypeStruct((B, splits, 3, fold_rows, 128),
                                       jnp.float32),
        grid_spec=pltpu.PrefetchScalarGridSpec(
            num_scalar_prefetch=0,
            grid=(B, splits, tiles_per_split),
            in_specs=[
                pl.BlockSpec((pl.Squeezed(), n_ch, tile_rows, 128), in_map),
                pl.BlockSpec((pl.Squeezed(), n_ch, tile_rows, 128), in_map),
            ],
            out_specs=pl.BlockSpec(
                (pl.Squeezed(), pl.Squeezed(), 3, fold_rows, 128), out_map),
        ),
        compiler_params=pltpu.CompilerParams(
            dimension_semantics=("parallel", "parallel", "arbitrary")),
    )(yh, yt)

    sums = jnp.sum(partials, axis=(0, 1, 3, 4))       # (3,)
    n_chan = B * H * W                                # elems per 1-channel map
    center_loss = sums[0] / n_chan                    # MSE, reduction='mean'
    boundary_loss = sums[1] / n_chan
    if compute_flow:
        flow_mean = sums[2] / (2 * n_chan)            # mean over both channels
    else:
        flow_mean = jnp.float32(0.0)                  # torch.mean(tensor(0.))
    sum_loss = soft_a * center_loss + soft_b * boundary_loss + soft_c * flow_mean
    return [center_loss, boundary_loss, flow_mean, sum_loss]


def _reference_loss(y_hat, y, *, soft_a, soft_b, soft_c, nonlinear_flow,
                    flow_c, soft_mask):
    """Pure-JAX reference mirroring the PyTorch module."""
    center, boundary, flow = y_hat[:, 0:1], y_hat[:, 1:2], y_hat[:, 2:]
    gt_center, gt_boundary, gt_flow = y[:, 0:1], y[:, 1:2], y[:, 2:]
    center_loss = jnp.mean((center - gt_center) ** 2)
    boundary_loss = jnp.mean((boundary - gt_boundary) ** 2)
    mask = jnp.clip(1.0 - gt_center - gt_boundary, 0.0, 1.0)
    if soft_c != 0:
        f = jnp.tanh(flow_c * flow) if nonlinear_flow else flow
        fl = jnp.abs(f - gt_flow)
        if soft_mask:
            fl = fl * mask
        flow_mean = jnp.mean(fl)
    else:
        flow_mean = jnp.float32(0.0)
    sum_loss = soft_a * center_loss + soft_b * boundary_loss + soft_c * flow_mean
    return [center_loss, boundary_loss, flow_mean, sum_loss]


def _check(y_hat, y, cfg, ref_inputs=None, rtol=1e-4, atol=1e-6, **kw):
    out = soft_pose_loss(y_hat, y, **cfg, **kw)
    out = [jax.block_until_ready(o) for o in out]
    ra, rb = (ref_inputs if ref_inputs is not None else (y_hat, y))
    ref = _reference_loss(ra, rb, **cfg)
    for got, want in zip(out, ref):
        np.testing.assert_allclose(np.asarray(got), np.asarray(want),
                                   rtol=rtol, atol=atol)


if __name__ == "__main__":
    key = jax.random.PRNGKey(0)
    k1, k2, k3, k4, k5, k6 = jax.random.split(key, 6)

    cfg = dict(soft_a=1.0, soft_b=2.0, soft_c=0.5,
               nonlinear_flow=True, flow_c=1.0, soft_mask=True)

    # 1) Base case: B=2, 16x16 (R=2, full-extent block).
    B, C, H, W = 2, 4, 16, 16
    y_hat = jax.random.normal(k1, (B, C, H, W), dtype=jnp.float32)
    y = jax.random.uniform(k2, (B, C, H, W), dtype=jnp.float32)
    _check(y_hat, y, cfg)

    # 2) soft_c == 0: flow math elided, only 2 channels DMA'd.
    _check(y_hat, y, dict(cfg, soft_c=0.0))

    # 3) Short last tile (R=10, tile_rows=8 -> in-kernel row mask), linear flow.
    y_hat_m = jax.random.normal(k3, (2, 4, 40, 32), dtype=jnp.float32)
    y_m = jax.random.uniform(k4, (2, 4, 40, 32), dtype=jnp.float32)
    _check(y_hat_m, y_m, dict(soft_a=0.7, soft_b=1.3, soft_c=1.0,
                              nonlinear_flow=False, flow_c=2.0,
                              soft_mask=False))

    # 4) Non-128-aligned spatial extent (pad path).
    y_hat_s = jax.random.normal(k5, (2, 4, 10, 10), dtype=jnp.float32)
    y_s = jax.random.uniform(k6, (2, 4, 10, 10), dtype=jnp.float32)
    _check(y_hat_s, y_s, cfg)

    # 5) B == 1 megacore split path (spatial halves on a parallel grid axis).
    y_hat_1 = jax.random.normal(k1, (1, 4, 128, 128), dtype=jnp.float32)
    y_1 = jax.random.uniform(k2, (1, 4, 128, 128), dtype=jnp.float32)
    _check(y_hat_1, y_1, cfg, max_tile_rows=64)

    # 6) bf16 inputs (native dtype fed to the kernel; f32 accumulation inside).
    y_hat_b = jax.random.normal(k3, (2, 4, 64, 32), dtype=jnp.bfloat16)
    y_b = jax.random.uniform(k4, (2, 4, 64, 32), dtype=jnp.bfloat16)
    _check(y_hat_b, y_b, cfg,
           ref_inputs=(y_hat_b.astype(jnp.float32), y_b.astype(jnp.float32)))

    print("KERNEL_OK")
</pallas_src>

<mosaic_0001>
module attributes {stable_mosaic.version = 11 : i64} {
  func.func @_soft_pose_kernel(%arg0: i32, %arg1: i32, %arg2: i32, %arg3: memref<1x4x2x128xf32, #tpu.memory_space<vmem>>, %arg4: memref<1x4x2x128xf32, #tpu.memory_space<vmem>>, %arg5: memref<1x1x3x2x128xf32, #tpu.memory_space<vmem>>) attributes {dimension_semantics = [#tpu.dimension_semantics<parallel>, #tpu.dimension_semantics<parallel>, #tpu.dimension_semantics<arbitrary>], iteration_bounds = array<i64: 2, 1, 1>, scalar_prefetch = 0 : i64, scratch_operands = 0 : i64, tpu.core_type = #tpu.core_type<tc>, window_params = [{transform_indices = @transform_0, window_bounds = array<i64: 1, 4, 2, 128>}, {transform_indices = @transform_1, window_bounds = array<i64: 1, 4, 2, 128>}, {transform_indices = @transform_2, window_bounds = array<i64: 1, 1, 3, 2, 128>}]} {
    %c0_i32 = arith.constant 0 : i32
    %0 = arith.cmpi eq, %arg2, %c0_i32 : i32
    %1 = arith.extui %0 : i1 to i32
    %c0_i32_0 = arith.constant 0 : i32
    %2 = arith.cmpi ne, %1, %c0_i32_0 : i32
    scf.if %2 {
      %cst_63 = arith.constant 0.000000e+00 : f32
      %60 = vector.broadcast %cst_63 : f32 to vector<3x2x128xf32>
      %c0_64 = arith.constant 0 : index
      %c0_65 = arith.constant 0 : index
      %c0_66 = arith.constant 0 : index
      %c0_67 = arith.constant 0 : index
      %c0_68 = arith.constant 0 : index
      %61 = vector.load %arg5[%c0_64, %c0_65, %c0_66, %c0_67, %c0_68] : memref<1x1x3x2x128xf32, #tpu.memory_space<vmem>>, vector<1x1x3x2x128xf32>
      %62 = vector.shape_cast %61 : vector<1x1x3x2x128xf32> to vector<3x2x128xf32>
      %63 = vector.shape_cast %60 : vector<3x2x128xf32> to vector<1x1x3x2x128xf32>
      tpu.vector_store %arg5[%c0_64, %c0_65, %c0_66, %c0_67, %c0_68], %63 {strides = array<i32>} : memref<1x1x3x2x128xf32, #tpu.memory_space<vmem>>, vector<1x1x3x2x128xf32>,
    } else {
    }
    %c0 = arith.constant 0 : index
    %c0_1 = arith.constant 0 : index
    %c0_2 = arith.constant 0 : index
    %c0_3 = arith.constant 0 : index
    %3 = vector.load %arg3[%c0, %c0_1, %c0_2, %c0_3] : memref<1x4x2x128xf32, #tpu.memory_space<vmem>>, vector<1x1x2x128xf32>
    %4 = vector.shape_cast %3 : vector<1x1x2x128xf32> to vector<2x128xf32>
    %c0_4 = arith.constant 0 : index
    %c0_5 = arith.constant 0 : index
    %c0_6 = arith.constant 0 : index
    %c0_7 = arith.constant 0 : index
    %5 = vector.load %arg4[%c0_4, %c0_5, %c0_6, %c0_7] : memref<1x4x2x128xf32, #tpu.memory_space<vmem>>, vector<1x1x2x128xf32>
    %6 = vector.shape_cast %5 : vector<1x1x2x128xf32> to vector<2x128xf32>
    %c0_8 = arith.constant 0 : index
    %c1 = arith.constant 1 : index
    %c0_9 = arith.constant 0 : index
    %c0_10 = arith.constant 0 : index
    %7 = vector.load %arg3[%c0_8, %c1, %c0_9, %c0_10] : memref<1x4x2x128xf32, #tpu.memory_space<vmem>>, vector<1x1x2x128xf32>
    %8 = vector.shape_cast %7 : vector<1x1x2x128xf32> to vector<2x128xf32>
    %c0_11 = arith.constant 0 : index
    %c1_12 = arith.constant 1 : index
    %c0_13 = arith.constant 0 : index
    %c0_14 = arith.constant 0 : index
    %9 = vector.load %arg4[%c0_11, %c1_12, %c0_13, %c0_14] : memref<1x4x2x128xf32, #tpu.memory_space<vmem>>, vector<1x1x2x128xf32>
    %10 = vector.shape_cast %9 : vector<1x1x2x128xf32> to vector<2x128xf32>
    %11 = arith.subf %4, %6 : vector<2x128xf32>
    %12 = arith.subf %8, %10 : vector<2x128xf32>
    %c0_15 = arith.constant 0 : index
    %c0_16 = arith.constant 0 : index
    %c0_17 = arith.constant 0 : index
    %c0_18 = arith.constant 0 : index
    %c0_19 = arith.constant 0 : index
    %13 = vector.load %arg5[%c0_15, %c0_16, %c0_17, %c0_18, %c0_19] : memref<1x1x3x2x128xf32, #tpu.memory_space<vmem>>, vector<1x1x1x2x128xf32>
    %14 = vector.shape_cast %13 : vector<1x1x1x2x128xf32> to vector<2x128xf32>
    %15 = arith.mulf %11, %11 : vector<2x128xf32>
    %16 = arith.addf %14, %15 : vector<2x128xf32>
    %c0_20 = arith.constant 0 : index
    %c0_21 = arith.constant 0 : index
    %c0_22 = arith.constant 0 : index
    %c0_23 = arith.constant 0 : index
    %c0_24 = arith.constant 0 : index
    %17 = vector.load %arg5[%c0_20, %c0_21, %c0_22, %c0_23, %c0_24] : memref<1x1x3x2x128xf32, #tpu.memory_space<vmem>>, vector<1x1x1x2x128xf32>
    %18 = vector.shape_cast %17 : vector<1x1x1x2x128xf32> to vector<2x128xf32>
    %19 = vector.shape_cast %16 : vector<2x128xf32> to vector<1x1x1x2x128xf32>
    tpu.vector_store %arg5[%c0_20, %c0_21, %c0_22, %c0_23, %c0_24], %19 {strides = array<i32>} : memref<1x1x3x2x128xf32, #tpu.memory_space<vmem>>, vector<1x1x1x2x128xf32>,
    %c0_25 = arith.constant 0 : index
    %c0_26 = arith.constant 0 : index
    %c1_27 = arith.constant 1 : index
    %c0_28 = arith.constant 0 : index
    %c0_29 = arith.constant 0 : index
    %20 = vector.load %arg5[%c0_25, %c0_26, %c1_27, %c0_28, %c0_29] : memref<1x1x3x2x128xf32, #tpu.memory_space<vmem>>, vector<1x1x1x2x128xf32>
    %21 = vector.shape_cast %20 : vector<1x1x1x2x128xf32> to vector<2x128xf32>
    %22 = arith.mulf %12, %12 : vector<2x128xf32>
    %23 = arith.addf %21, %22 : vector<2x128xf32>
    %c0_30 = arith.constant 0 : index
    %c0_31 = arith.constant 0 : index
    %c1_32 = arith.constant 1 : index
    %c0_33 = arith.constant 0 : index
    %c0_34 = arith.constant 0 : index
    %24 = vector.load %arg5[%c0_30, %c0_31, %c1_32, %c0_33, %c0_34] : memref<1x1x3x2x128xf32, #tpu.memory_space<vmem>>, vector<1x1x1x2x128xf32>
    %25 = vector.shape_cast %24 : vector<1x1x1x2x128xf32> to vector<2x128xf32>
    %26 = vector.shape_cast %23 : vector<2x128xf32> to vector<1x1x1x2x128xf32>
    tpu.vector_store %arg5[%c0_30, %c0_31, %c1_32, %c0_33, %c0_34], %26 {strides = array<i32>} : memref<1x1x3x2x128xf32, #tpu.memory_space<vmem>>, vector<1x1x1x2x128xf32>,
    %c0_35 = arith.constant 0 : index
    %c2 = arith.constant 2 : index
    %c0_36 = arith.constant 0 : index
    %c0_37 = arith.constant 0 : index
    %27 = vector.load %arg3[%c0_35, %c2, %c0_36, %c0_37] : memref<1x4x2x128xf32, #tpu.memory_space<vmem>>, vector<1x1x2x128xf32>
    %28 = vector.shape_cast %27 : vector<1x1x2x128xf32> to vector<2x128xf32>
    %c0_38 = arith.constant 0 : index
    %c2_39 = arith.constant 2 : index
    %c0_40 = arith.constant 0 : index
    %c0_41 = arith.constant 0 : index
    %29 = vector.load %arg4[%c0_38, %c2_39, %c0_40, %c0_41] : memref<1x4x2x128xf32, #tpu.memory_space<vmem>>, vector<1x1x2x128xf32>
    %30 = vector.shape_cast %29 : vector<1x1x2x128xf32> to vector<2x128xf32>
    %c0_42 = arith.constant 0 : index
    %c3 = arith.constant 3 : index
    %c0_43 = arith.constant 0 : index
    %c0_44 = arith.constant 0 : index
    %31 = vector.load %arg3[%c0_42, %c3, %c0_43, %c0_44] : memref<1x4x2x128xf32, #tpu.memory_space<vmem>>, vector<1x1x2x128xf32>
    %32 = vector.shape_cast %31 : vector<1x1x2x128xf32> to vector<2x128xf32>
    %c0_45 = arith.constant 0 : index
    %c3_46 = arith.constant 3 : index
    %c0_47 = arith.constant 0 : index
    %c0_48 = arith.constant 0 : index
    %33 = vector.load %arg4[%c0_45, %c3_46, %c0_47, %c0_48] : memref<1x4x2x128xf32, #tpu.memory_space<vmem>>, vector<1x1x2x128xf32>
    %34 = vector.shape_cast %33 : vector<1x1x2x128xf32> to vector<2x128xf32>
    %cst = arith.constant 1.000000e+00 : f32
    %35 = vector.broadcast %cst : f32 to vector<2x128xf32>
    %36 = arith.mulf %35, %28 : vector<2x128xf32>
    %37 = math.tanh %36 : vector<2x128xf32>
    %38 = arith.subf %37, %30 : vector<2x128xf32>
    %cst_49 = arith.constant 1.000000e+00 : f32
    %39 = vector.broadcast %cst_49 : f32 to vector<2x128xf32>
    %40 = arith.mulf %39, %32 : vector<2x128xf32>
    %41 = math.tanh %40 : vector<2x128xf32>
    %42 = arith.subf %41, %34 : vector<2x128xf32>
    %43 = math.absf %38 : vector<2x128xf32>
    %44 = math.absf %42 : vector<2x128xf32>
    %45 = arith.addf %43, %44 : vector<2x128xf32>
    %cst_50 = arith.constant 1.000000e+00 : f32
    %46 = vector.broadcast %cst_50 : f32 to vector<2x128xf32>
    %47 = arith.subf %46, %6 : vector<2x128xf32>
    %48 = arith.subf %47, %10 : vector<2x128xf32>
    %cst_51 = arith.constant 0.000000e+00 : f32
    %cst_52 = arith.constant 1.000000e+00 : f32
    %49 = vector.broadcast %cst_51 : f32 to vector<2x128xf32>
    %50 = arith.maximumf %49, %48 : vector<2x128xf32>
    %51 = vector.broadcast %cst_52 : f32 to vector<2x128xf32>
    %52 = arith.minimumf %51, %50 : vector<2x128xf32>
    %53 = arith.mulf %45, %52 : vector<2x128xf32>
    %c0_53 = arith.constant 0 : index
    %c0_54 = arith.constant 0 : index
    %c2_55 = arith.constant 2 : index
    %c0_56 = arith.constant 0 : index
    %c0_57 = arith.constant 0 : index
    %54 = vector.load %arg5[%c0_53, %c0_54, %c2_55, %c0_56, %c0_57] : memref<1x1x3x2x128xf32, #tpu.memory_space<vmem>>, vector<1x1x1x2x128xf32>
    %55 = vector.shape_cast %54 : vector<1x1x1x2x128xf32> to vector<2x128xf32>
    %56 = arith.addf %55, %53 : vector<2x128xf32>
    %c0_58 = arith.constant 0 : index
    %c0_59 = arith.constant 0 : index
    %c2_60 = arith.constant 2 : index
    %c0_61 = arith.constant 0 : index
    %c0_62 = arith.constant 0 : index
    %57 = vector.load %arg5[%c0_58, %c0_59, %c2_60, %c0_61, %c0_62] : memref<1x1x3x2x128xf32, #tpu.memory_space<vmem>>, vector<1x1x1x2x128xf32>
    %58 = vector.shape_cast %57 : vector<1x1x1x2x128xf32> to vector<2x128xf32>
    %59 = vector.shape_cast %56 : vector<2x128xf32> to vector<1x1x1x2x128xf32>
    tpu.vector_store %arg5[%c0_58, %c0_59, %c2_60, %c0_61, %c0_62], %59 {strides = array<i32>} : memref<1x1x3x2x128xf32, #tpu.memory_space<vmem>>, vector<1x1x1x2x128xf32>,
    return
  }
  func.func @transform_0(%arg0: i32, %arg1: i32, %arg2: i32) -> (i32, i32, i32, i32) {
    %c1_i32 = arith.constant 1 : i32
    %0 = arith.muli %arg1, %c1_i32 : i32
    %1 = arith.addi %0, %arg2 : i32
    %c0_i32 = arith.constant 0 : i32
    %c0_i32_0 = arith.constant 0 : i32
    %c0_i32_1 = arith.constant 0 : i32
    return %arg0, %c0_i32, %1, %c0_i32_0 : i32, i32, i32, i32
  }
  func.func @transform_1(%arg0: i32, %arg1: i32, %arg2: i32) -> (i32, i32, i32, i32) {
    %c1_i32 = arith.constant 1 : i32
    %0 = arith.muli %arg1, %c1_i32 : i32
    %1 = arith.addi %0, %arg2 : i32
    %c0_i32 = arith.constant 0 : i32
    %c0_i32_0 = arith.constant 0 : i32
    %c0_i32_1 = arith.constant 0 : i32
    return %arg0, %c0_i32, %1, %c0_i32_0 : i32, i32, i32, i32
  }
  func.func @transform_2(%arg0: i32, %arg1: i32, %arg2: i32) -> (i32, i32, i32, i32, i32) {
    %c0_i32 = arith.constant 0 : i32
    %c0_i32_0 = arith.constant 0 : i32
    %c0_i32_1 = arith.constant 0 : i32
    %c0_i32_2 = arith.constant 0 : i32
    return %arg0, %arg1, %c0_i32, %c0_i32_0, %c0_i32_1 : i32, i32, i32, i32, i32
  }
}

</mosaic_0001>

<bundles_post_ra>
// kernel: tpu_custom_call.1
= control target key start
LH: loop header
LB: loop body
LE: loop exit
PB: predicated region body
PF: predicated region fallthrough
CT: control target
= control target key end

     0   :  { %7 = vsyncpa [#allocation3], 0  ;;  %s943_s0 = inlined_call_operand.hbm [shape: f32[2,4,2,128], index: 0, kind: input, shape index: {}]   ;;  %s944_s1 = inlined_call_operand.hbm [shape: f32[2,4,2,128], index: 1, kind: input, shape index: {}]   ;;  %s945_s2 = inlined_call_operand.hbm [shape: f32[2,1,3,2,128], index: 2, kind: output, shape index: {}]  }
   0x1   :  { %9 = vsyncpa [#allocation3 + $0x1], 0 }
   0x2   :  { %10 = vsyncpa [#allocation6], 0 }
   0x3   :  { %12 = vsyncpa [#allocation6 + $0x1], 0 }
   0x4   :  { %13 = vsyncpa [#allocation4], 0 }
   0x5   :  { %15 = vsyncpa [#allocation4 + $0x1], 0  ;;  %s694_s9 = smov 0   ;;  %s696_s10 = smov 0  }
   0x6   :  { %s698_s11 = smov 0   ;;  %s700_s12 = smov 0  }
   0x7   :  { %s702_s13 = smov 0   ;;  %s704_s14 = smov 0  }
   0x8 LB: > { %s417_s15 = sadd.s32 4294967295, %s669_s14   ;;  %s418_s16 = sadd.s32 4294967294, %s669_s14   ;;  %s669_s14 = sphi %s704_s14, %s21_s14   ;;  %s665_s13 = sphi %s702_s13, %s963_s13   ;;  %s661_s12 = sphi %s700_s12, %s962_s12   ;;  %s657_s11 = sphi %s698_s11, %s961_s11   ;;  %s653_s10 = sphi %s696_s10, %s960_s10   ;;  %s649_s9 = sphi %s694_s9, %s959_s9  }
   0x9   : > { %s40_s17 = sadd.s32 1, %s665_s13  ;;  %s51_s18 = sadd.s32 1, %s657_s11 }
   0xa   : > { %p42_p0 = scmp.ge.s32.totalorder %s40_s17, 2  ;;  %p58_p1 = scmp.ne.s32.totalorder %s657_s11, %s653_s10 }
   0xb   : > { %p59_p2 = scmp.eq.s32.totalorder %s669_s14, 0  ;;  %p64_p3 = scmp.ne.s32.totalorder %s653_s10, %s649_s9 }
   0xc   : > { %s965_s17 = smov (%p42_p0, %s40_s17), 0  ;;  %p65_p5 = scmp.eq.s32.totalorder %s417_s15, 0 }
   0xd   : > { %p735_p4 = por %p59_p2, %p58_p1  ;;  %s46_s20 = ssub.s32 %s665_s13, %s965_s17 }
   0xe   : > { %p120_p6 = scmp.eq.s32.totalorder %s417_s15, 1  ;;  %p49_p7 = scmp.eq.s32.totalorder %s46_s20, 0 }
   0xf   : > { %p741_p8 = por %p65_p5, %p64_p3  ;;  %p126_p10 = scmp.eq.s32.totalorder %s418_s16, 1 }
  0x10   : > { %p745_p9 = por %p120_p6, %p58_p1  ;;  %p464_p13 = scmp.lt.s32.totalorder %s669_s14, 2 }
  0x11   : > { %s949_s21 = scalar_select %p741_p8, 1, 0 }
  0x12   : > { %s950_s22 = scalar_select %p745_p9, 1, 0 }
  0x13   : > { %s750_s23 = scalar_select %p49_p7, %s657_s11, %s51_s18  }
  0x14   : > { %p752_p11 = por %p126_p10, %p64_p3  ;;  %s759_s25 = sand.u32 1, %s657_s11  }
  0x15   : > { %s421_s26 = sshll.u32 %s759_s25, 3  ;;  %s443_s27 = sshll.u32 %s665_s13, 7 }
  0x16   : > { %s951_s24 = scalar_select %p752_p11, 1, 0 }
  0x17   : > { %s768_s30 = scalar_lea.hbm %s943_s0, %s443_s27  ;;  %s150_s3 = scalar_lea.vmem [#allocation2], %s421_s26 }
  0x18   : > { %s159_s4 = sshll.u32 %s150_s3, 4  ;;  %p776_p0 = pnand %p464_p13, %p735_p4  ;;  %s772_s4 = int_to_ptr.vmem [resolvable:$true] %s159_s4 }
  0x19   : > { %s147_s6 = scalar_lea.sflag [#allocation3], %s759_s25  ;;  %s523_s7 = scalar_lea.hbm %s768_s30, 128 }
  0x1a   : > { %p524_p2 = scmp.ne.s32.totalorder %s768_s30, %s523_s7  ;;  %p525_p3 = pneg %p776_p0 }
  0x1b   : > { %s528_s16 = scalar_lea.hbm %s943_s0, 256  ;;  %p529_p4 = scmp.lt.u32.totalorder %s768_s30, %s943_s0 }
  0x1c   : > { %p526_p5 = pnand %p525_p3, %p524_p2  ;;  %p530_p7 = scmp.lt.u32.totalorder %s528_s16, %s523_s7 }
  0x1d   : > { %p532_p13 = scmp.lt.u32.totalorder %s523_s7, %s768_s30 }
  0x1e   : > { %p527_p6 = pneg %p526_p5  ;;  %p531_p10 = por %p530_p7, %p529_p4 }
  0x20   : > { %p533_p12 = por %p532_p13, %p531_p10 }
  0x22   : > { %p534_p1 = pnand %p533_p12, %p527_p6 }
  0x24   : > { %537 = shalt.err (!%p534_p1)
}
  0x25   : > { %s538_s20 = scalar_lea.vmem %s772_s4, 128  ;;  %s671_s28 = smov [#allocation2]  }
  0x26   : > { %p539_p2 = scmp.ne.s32.totalorder %s772_s4, %s538_s20  ;;  %s543_s29 = sshll.u32 %s671_s28, 4  ;;  %s544_s29 = int_to_ptr.vmem [resolvable:$false] %s543_s29 }
  0x27   : > { %s545_s3 = scalar_lea.vmem %s544_s29, 256  ;;  %p546_p9 = scmp.lt.s32.totalorder %s772_s4, %s544_s29 }
  0x28   : > { %p541_p5 = pnand %p539_p2, %p525_p3  ;;  %p547_p4 = scmp.lt.s32.totalorder %s545_s3, %s538_s20 }
  0x2a   : > { %p542_p11 = pneg %p541_p5  ;;  %p548_p7 = por %p547_p4, %p546_p9 }
  0x2c   : > { %p549_p10 = pnand %p548_p7, %p542_p11 }
  0x2e   : > { %552 = shalt.err (!%p549_p10)
}
  0x2f   : > { %s672_s7 = smov 32   ;;  %s673_s8 = smov 2  }
  0x30   : > { %456 = dma.hbm_to_vmem [thread:$0]  (!%p776_p0), %s768_s30, 128, %s772_s4, %s147_s6, %s672_s7, %s672_s7, %s673_s8  }
  0x31   : > { %p190_p9 = scmp.lt.s32.totalorder %s669_s14, 3  ;;  %s818_s18 = scalar_lea.hbm %s944_s1, %s443_s27 }
  0x32   : > { %p953_p11 = scmp.ge.s32.totalorder %s669_s14, 1  ;;  %s173_s20 = scalar_lea.vmem [#allocation5], %s421_s26 }
  0x33   : > { %s182_s28 = sshll.u32 %s173_s20, 4  ;;  %s170_s30 = scalar_lea.sflag [#allocation6], %s759_s25  ;;  %s828_s28 = int_to_ptr.vmem [resolvable:$true] %s182_s28 }
  0x34   : > { %p822_p12 = pnand %p953_p11, %p190_p9  ;;  %s553_s4 = scalar_lea.hbm %s818_s18, 128 }
  0x35   : > { %p554_p1 = scmp.ne.s32.totalorder %s818_s18, %s553_s4  ;;  %s558_s29 = scalar_lea.hbm %s944_s1, 256 }
  0x36   : > { %p559_p2 = scmp.lt.u32.totalorder %s818_s18, %s944_s1  ;;  %p560_p5 = scmp.lt.u32.totalorder %s558_s29, %s553_s4 }
  0x37   : > { %p556_p6 = pnand %p554_p1, %p525_p3  ;;  %p562_p7 = scmp.lt.u32.totalorder %s553_s4, %s818_s18 }
  0x38   : > { %p561_p4 = por %p560_p5, %p559_p2 }
  0x39   : > { %p557_p13 = pneg %p556_p6 }
  0x3a   : > { %p563_p10 = por %p562_p7, %p561_p4 }
  0x3c   : > { %p564_p9 = pnand %p563_p10, %p557_p13 }
  0x3e   : > { %567 = shalt.err (!%p564_p9)
}
  0x3f   : > { %s568_s26 = scalar_lea.vmem %s828_s28, 128  ;;  %s674_s16 = smov [#allocation5]  }
  0x40   : > { %p569_p11 = scmp.ne.s32.totalorder %s828_s28, %s568_s26  ;;  %s573_s20 = sshll.u32 %s674_s16, 4  ;;  %s574_s20 = int_to_ptr.vmem [resolvable:$false] %s573_s20 }
  0x41   : > { %s575_s27 = scalar_lea.vmem %s574_s20, 256  ;;  %p576_p8 = scmp.lt.s32.totalorder %s828_s28, %s574_s20 }
  0x42   : > { %p571_p1 = pnand %p569_p11, %p525_p3  ;;  %p577_p2 = scmp.lt.s32.totalorder %s575_s27, %s568_s26 }
  0x44   : > { %p572_p6 = pneg %p571_p1  ;;  %p578_p5 = por %p577_p2, %p576_p8 }
  0x46   : > { %p579_p4 = pnand %p578_p5, %p572_p6 }
  0x48   : > { %582 = shalt.err (!%p579_p4)
}
  0x49   : > { %459 = dma.hbm_to_vmem [thread:$0]  (!%p776_p0), %s818_s18, 128, %s828_s28, %s170_s30, %s672_s7, %s672_s7, %s673_s8  }
  0x4a   : > { %194 = sbr.rel (%p822_p12) target bundleno = 124 (0x7c), region = 28  ;;  %s862_s4 = sand.u32 (!%p822_p12), 1, %s653_s10  }
  0x4b   : > { %s428_s6 = sshll.u32 (!%p822_p12), %s862_s4, 3  ;;  %s197_s29 = scalar_lea.sflag (!%p822_p12), [#allocation3], %s862_s4 }
  0x4c   : > { %s200_s5 = scalar_lea.vmem (!%p822_p12), [#allocation2], %s428_s6  ;;  %p955_p8 = scmp.ne.s32.totalorder (!%p822_p12), %s949_s21, 0 }
  0x51   : > { %636 = dma.done.wait (%p955_p8), %s197_s29, 128  }
  0x52   : > { %638 = vsyncadd (%p955_p8), %s197_s29, 4294967168  ;;  %s206_s25 = scalar_lea.sflag [#allocation6], %s862_s4  ;;  %s209_s7 = scalar_lea.vmem [#allocation5], %s428_s6 }
  0x53   : > { %640 = dma.done.wait (%p955_p8), %s206_s25, 128  }
  0x54   : > { %642 = vsyncadd (%p955_p8), %s206_s25, 4294967168  ;;  %s445_s8 = smul.u32 6, %s862_s4  ;;  %v675_v0 = vmov 0.0   ;;  %v244_v1 = vld [vmem:[%s200_s5] sm:$0x3]  ;;  %s286_s15 = scalar_lea.sflag [#allocation4], %s862_s4 }
  0x55   : > { %v245_v2 = vld [vmem:[%s209_s7] sm:$0x3]  ;;  %v430_v3 = vld [vmem:[%s200_s5 + $0x2] sm:$0x3]  ;;  %v431_v5 = vld [vmem:[%s209_s7 + $0x2] sm:$0x3] }
  0x56   : > { %s876_s18 = scalar_lea.vmem [#allocation7], %s445_s8  ;;  %v250_v4 = vsub.f32 %v244_v1, %v245_v2  ;;  %v434_v6 = vld [vmem:[%s200_s5 + $0x4] sm:$0x3]  ;;  %v251_v7 = vsub.f32 %v430_v3, %v431_v5  ;;  %v436_v8 = vld [vmem:[%s200_s5 + $0x6] sm:$0x3]  ;;  %v276_v12 = vsub.f32 1.0, %v245_v2 }
  0x57   : > { %241 = vst [vmem:[%s876_s18] sm:$0x3] %v675_v0  ;;  %242 = vst [vmem:[%s876_s18 + $0x2] sm:$0x3] %v675_v0  ;;  %519 = vtanh.f32 %v434_v6  ;;  %v435_v17 = vld [vmem:[%s209_s7 + $0x4] sm:$0x3]  ;;  %s446_s21 = smul.u32 96, %s661_s12 }
  0x58   : > { %243 = vst [vmem:[%s876_s18 + $0x4] sm:$0x3] %v675_v0  ;;  %v253_v10 = vmul.f32 %v250_v4, %v250_v4  ;;  %521 = vtanh.f32 %v436_v8  ;;  %v258_v13 = vmul.f32 %v251_v7, %v251_v7  ;;  %v277_v16 = vsub.f32 %v276_v12, %v431_v5  ;;  %v437_v18 = vld [vmem:[%s209_s7 + $0x6] sm:$0x3]  ;;  %s301_s19 = sshll.u32 %s876_s18, 4  ;;  %p956_p3 = scmp.ne.s32.totalorder %s950_s22, 0  ;;  %s893_s19 = int_to_ptr.vmem [resolvable:$true] %s301_s19 }
  0x59   : > { %s891_s3 = scalar_lea.hbm %s945_s2, %s446_s21  ;;  %s583_s26 = scalar_lea.vmem %s893_s19, 96 }
  0x5a   : > { %v278_v20 = vmax.f32 %v277_v16, 0.0  ;;  %p584_p0 = scmp.ne.s32.totalorder %s893_s19, %s583_s26  ;;  %s676_s12 = smov [#allocation7]  }
  0x5b   : > { %s587_s16 = sshll.u32 %s676_s12, 4  ;;  %s588_s16 = int_to_ptr.vmem [resolvable:$false] %s587_s16 }
  0x5c   : > { %v279_v26 = vmin.f32 %v278_v20, 1.0  ;;  %p585_p12 = pnand %p584_p0, %p956_p3  ;;  %s589_s20 = scalar_lea.vmem %s588_s16, 192 }
  0x5d   : > { %p590_p7 = scmp.lt.s32.totalorder %s893_s19, %s588_s16  ;;  %p591_p10 = scmp.lt.s32.totalorder %s589_s20, %s583_s26 }
  0x5e   : > { %v252_v9 = vld [vmem:[%s876_s18] sm:$0x3]  ;;  %v432_v11 = vld [vmem:[%s876_s18 + $0x2] sm:$0x3]  ;;  %p586_p13 = pneg %p585_p12 }
  0x5f   : > { %v254_v14 = vadd.f32 %v253_v10, %v252_v9  ;;  %v259_v15 = vadd.f32 %v432_v11, %v258_v13  ;;  %v438_v28 = vld [vmem:[%s876_s18 + $0x4] sm:$0x3]  ;;  %p592_p9 = por %p591_p10, %p590_p7 }
  0x61   : > { %255 = vst [vmem:[%s876_s18] sm:$0x3] %v254_v14  ;;  %433 = vst [vmem:[%s876_s18 + $0x2] sm:$0x3] %v259_v15  ;;  %v520_v19 = vpop.eup %519  ;;  %p593_p11 = pnand %p592_p9, %p586_p13 }
  0x62   : > { %v522_v21 = vpop.eup %521  ;;  %v270_v22 = vsub.f32 %v520_v19, %v435_v17 }
  0x63   : > { %v272_v23 = vsub.f32 %v522_v21, %v437_v18 }
  0x64   : > { %v273_v24 = vand.u32 2147483647, %v270_v22 }
  0x65   : > { %v274_v25 = vand.u32 2147483647, %v272_v23 }
  0x67   : > { %v275_v27 = vadd.f32 %v274_v25, %v273_v24 }
  0x69   : > { %v280_v29 = vmul.f32 %v279_v26, %v275_v27 }
  0x6b   : > { %v283_v30 = vadd.f32 %v438_v28, %v280_v29 }
  0x6d   : > { %439 = vst [vmem:[%s876_s18 + $0x4] sm:$0x3] %v283_v30 }
  0x6e   : > { %596 = shalt.err (!%p593_p11)
}
  0x6f   : > { %s597_s27 = scalar_lea.hbm %s891_s3, 96  ;;  %s601_s5 = scalar_lea.hbm %s945_s2, 192 }
  0x70   : > { %p598_p1 = scmp.ne.s32.totalorder %s891_s3, %s597_s27  ;;  %p602_p5 = scmp.lt.u32.totalorder %s891_s3, %s945_s2 }
  0x71   : > { %p603_p4 = scmp.lt.u32.totalorder %s601_s5, %s597_s27  ;;  %p605_p0 = scmp.lt.u32.totalorder %s597_s27, %s891_s3 }
  0x72   : > { %p599_p6 = pnand %p598_p1, %p956_p3 }
  0x73   : > { %p604_p8 = por %p603_p4, %p602_p5 }
  0x74   : > { %p600_p2 = pneg %p599_p6 }
  0x75   : > { %p606_p12 = por %p605_p0, %p604_p8 }
  0x77   : > { %p607_p13 = pnand %p606_p12, %p600_p2 }
  0x79   : > { %610 = shalt.err (!%p607_p13)
}
  0x7a   : > { %s677_s8 = smov 32   ;;  %s678_s18 = smov 2  }
  0x7b   : > { %451 = dma.vmem_to_hbm [thread:$0]  (%p956_p3), %s893_s19, 96, %s891_s3, %s286_s15, %s677_s8, %s677_s8, %s678_s18  }
  0x7c PF: > { %s316_s21 = sand.u32 1, %s649_s9   ;;  %p957_p7 = scmp.ne.s32.totalorder %s951_s24, 0 }
  0x7d   : > { %p958_p10 = scmp.ge.s32.totalorder %s669_s14, 2  ;;  %s317_s28 = scalar_lea.sflag [#allocation4], %s316_s21 }
  0x7f   : > { %p461_p9 = pnand %p958_p10, %p957_p7 }
  0x81   : > { %644 = dma.done.wait (!%p461_p9), %s317_s28, 96  }
  0x82   : > { %646 = vsyncadd (!%p461_p9), %s317_s28, 4294967200  ;;  %s21_s14 = sadd.s32 1, %s669_s14   ;;  %s959_s9 = smov %s653_s10 }
  0x83   : > { %p18_p11 = scmp.ge.s32.totalorder %s21_s14, 4   ;;  %s960_s10 = smov %s657_s11 }
  0x84   : > { %s961_s11 = smov %s750_s23  ;;  %s962_s12 = smov %s665_s13 }
  0x85   : > { %s963_s13 = smov %s965_s17  ;;  %20 = sbr.rel (!%p18_p11) target bundleno = 8 (0x8), region = 98 }
  0x8c   :  { %322 = vsyncpa [#allocation3], 1 }
  0x8d   :  { %324 = vsyncpa [#allocation3 + $0x1], 1 }
  0x8e   :  { %325 = vsyncpa [#allocation6], 1 }
  0x8f   :  { %327 = vsyncpa [#allocation6 + $0x1], 1 }
  0x90   :  { %328 = vsyncpa [#allocation4], 1 }
  0x91   :  { %330 = vsyncpa [#allocation4 + $0x1], 1 }

</bundles_post_ra>
